<compile_context>
chip_gen: v7x
topology: tpu7x:2x2x1
jax: 0.10.0
libtpu: 0.0.40
codegen_flags: <defaults>
</compile_context>

<pallas_src>
import jax
import jax.numpy as jnp
from jax.experimental import pallas as pl
from jax.experimental.pallas import tpu as pltpu


def _round_up(x, m):
    return ((x + m - 1) // m) * m


def path_attention_kernel(p_ref, h_ref, o_ref):
    # p_ref: (TB, L, D)  parent node embeddings for this batch block
    # h_ref: (TB, 1, D)  final node embedding for this batch block
    # o_ref: (TB, D)     attended hidden states
    p = p_ref[...]                                   # (TB, L, D), native dtype
    h = h_ref[...]                                   # (TB, 1, D), native dtype

    # Attention scores: per-(batch,row) dot(P_l, h) via VPU broadcast-multiply
    # + lane (last-axis) reduce; accumulate in f32.
    scores = jnp.sum(p * h, axis=-1, keepdims=True, dtype=jnp.float32)  # (TB, L, 1)

    # Numerically-stable softmax over L (PyTorch F.softmax(..., dim=1)).
    # Exact reciprocal (the approx EUP reciprocal was the previous mismatch);
    # it is only TB divisions, negligible for a memory-bound kernel.
    m = jnp.max(scores, axis=1, keepdims=True)                          # (TB, 1, 1)
    e = jnp.exp(scores - m)                                             # (TB, L, 1) f32
    denom = jnp.sum(e, axis=1, keepdims=True)                           # (TB, 1, 1)
    w = e * (1.0 / denom)                                               # (TB, L, 1) f32

    # Weighted sum over L in full f32 (no downcast of the normalized weights),
    # sublane reduce over L -> lane-dense (TB, D) output block.
    out = jnp.sum(w * p, axis=1, dtype=jnp.float32)                     # (TB, D) f32
    o_ref[...] = out.astype(o_ref.dtype)


def _vmem_block_estimate(tb, L, D, in_itemsize, out_itemsize):
    """Conservative per-step VMEM footprint (double-buffered I/O + f32 temps)."""
    lane = 128
    d_pad = _round_up(D, lane)
    p_blk = tb * L * d_pad * in_itemsize            # (tb, L, D) input tile
    h_blk = tb * 8 * d_pad * in_itemsize            # (tb, 1, D): sublane-padded x8
    o_blk = tb * d_pad * out_itemsize               # (tb, D) output tile
    temps = 4 * tb * _round_up(L, 8) * lane * 4     # (tb, L, 1) f32 softmax temps
    return 2 * (p_blk + h_blk + o_blk) + temps


def path_attention(parient_node_emb, final_node_emb, *, tb=None):
    """parient_node_emb: [B, L, D], final_node_emb: [B, 1, D] -> [B, D]."""
    B, L, D = parient_node_emb.shape
    assert final_node_emb.shape == (B, 1, D)
    dtype = parient_node_emb.dtype
    in_itemsize = jnp.dtype(dtype).itemsize
    out_itemsize = in_itemsize

    vmem_budget = 40 << 20  # headroom under v7x's 64 MiB physical VMEM

    if tb is None:
        if B <= 8:
            # One block == whole (small) batch; block dims equal the full array
            # dims, so no padding and no ragged edge for tiny batches.
            tb = B
        else:
            # ~4 MiB of P per block amortizes the ~0.35 us/step pipeline
            # overhead while staying well inside the VMEM budget.
            target_bytes = 4 << 20
            tb = (target_bytes // max(1, L * D * in_itemsize)) // 8 * 8
            tb = max(8, tb)
            # Keep >= 2 grid steps so v7x's two TensorCores both get work.
            tb = min(tb, max(8, _round_up(pl.cdiv(B, 2), 8)))
            tb = min(tb, _round_up(B, 8))

    # Shrink tb until the double-buffered working set fits the VMEM budget.
    while tb > 8 and _vmem_block_estimate(tb, L, D, in_itemsize, out_itemsize) > vmem_budget:
        tb = max(8, (tb // 2) // 8 * 8)
    est = _vmem_block_estimate(tb, L, D, in_itemsize, out_itemsize)
    # TODO(synk): for very large L*D even a minimal batch block overflows VMEM;
    # that case needs a second ('arbitrary') grid axis over L with an online
    # two-pass softmax instead of loading the full (tb, L, D) slab.
    assert est <= (48 << 20), "per-block VMEM footprint too large; split the L axis"

    grid = (pl.cdiv(B, tb),)
    vmem_limit = int(min(48 << 20, max(16 << 20, est + (2 << 20))))

    out = pl.pallas_call(
        path_attention_kernel,
        out_shape=jax.ShapeDtypeStruct((B, D), dtype),
        grid_spec=pltpu.PrefetchScalarGridSpec(
            num_scalar_prefetch=0,
            grid=grid,
            in_specs=[
                pl.BlockSpec((tb, L, D), lambda b: (b, 0, 0)),
                pl.BlockSpec((tb, 1, D), lambda b: (b, 0, 0)),
            ],
            out_specs=pl.BlockSpec((tb, D), lambda b: (b, 0)),
        ),
        compiler_params=pltpu.CompilerParams(
            dimension_semantics=("parallel",),
            vmem_limit_bytes=vmem_limit,
        ),
    )(parient_node_emb, final_node_emb)

    return out


def path_attention_ref(parient_node_emb, final_node_emb):
    """Pure-JAX reference mirroring the PyTorch forward (full f32 precision)."""
    hidden = jnp.squeeze(final_node_emb, axis=1)                       # [B, D]
    attn = jnp.einsum("bld,bd->bl", parient_node_emb, hidden,
                      precision=jax.lax.Precision.HIGHEST)             # [B, L]
    soft = jax.nn.softmax(attn, axis=1)                                # [B, L]
    return jnp.einsum("bld,bl->bd", parient_node_emb, soft,
                      precision=jax.lax.Precision.HIGHEST)             # [B, D]


if __name__ == "__main__":
    # Small shapes consistent with the forward: batch=2, path length=8, hidden=32.
    B, L, D = 2, 8, 32
    key = jax.random.PRNGKey(0)
    k1, k2 = jax.random.split(key)
    parient_node_emb = jax.random.normal(k1, (B, L, D), dtype=jnp.float32)
    final_node_emb = jax.random.normal(k2, (B, 1, D), dtype=jnp.float32)

    out = path_attention(parient_node_emb, final_node_emb)
    out = jax.block_until_ready(out)

    ref = path_attention_ref(parient_node_emb, final_node_emb)
    assert out.shape == (B, D)
    # Exact f32 softmax in the kernel -> tight tolerance vs the f32 reference.
    assert jnp.allclose(out, ref, atol=1e-4, rtol=1e-4), "mismatch vs reference"

    print("KERNEL_OK")
</pallas_src>

<mosaic_0001>
module attributes {stable_mosaic.version = 11 : i64} {
  func.func @path_attention_kernel(%arg0: i32, %arg1: memref<2x8x32xf32, #tpu.memory_space<vmem>>, %arg2: memref<2x1x32xf32, #tpu.memory_space<vmem>>, %arg3: memref<2x32xf32, #tpu.memory_space<vmem>>) attributes {dimension_semantics = [#tpu.dimension_semantics<parallel>], iteration_bounds = array<i64: 1>, scalar_prefetch = 0 : i64, scratch_operands = 0 : i64, tpu.core_type = #tpu.core_type<tc>, window_params = [{transform_indices = @transform_0, window_bounds = array<i64: 2, 8, 32>}, {transform_indices = @transform_1, window_bounds = array<i64: 2, 1, 32>}, {transform_indices = @transform_2, window_bounds = array<i64: 2, 32>}]} {
    %c0 = arith.constant 0 : index
    %c0_0 = arith.constant 0 : index
    %c0_1 = arith.constant 0 : index
    %0 = vector.load %arg1[%c0, %c0_0, %c0_1] : memref<2x8x32xf32, #tpu.memory_space<vmem>>, vector<2x8x32xf32>
    %c0_2 = arith.constant 0 : index
    %c0_3 = arith.constant 0 : index
    %c0_4 = arith.constant 0 : index
    %1 = vector.load %arg2[%c0_2, %c0_3, %c0_4] : memref<2x1x32xf32, #tpu.memory_space<vmem>>, vector<2x1x32xf32>
    %2 = vector.broadcast %1 : vector<2x1x32xf32> to vector<2x8x32xf32>
    %3 = arith.mulf %0, %2 : vector<2x8x32xf32>
    %cst = arith.constant dense<0.000000e+00> : vector<2x8xf32>
    %4 = vector.multi_reduction <add>, %3, %cst [2] : vector<2x8x32xf32> to vector<2x8xf32>
    %5 = vector.shape_cast %4 : vector<2x8xf32> to vector<2x8x1xf32>
    %cst_5 = arith.constant dense<0xFF800000> : vector<2x1xf32>
    %6 = vector.multi_reduction <maximumf>, %5, %cst_5 [1] : vector<2x8x1xf32> to vector<2x1xf32>
    %7 = vector.shape_cast %6 : vector<2x1xf32> to vector<2x1x1xf32>
    %8 = vector.broadcast %7 : vector<2x1x1xf32> to vector<2x8x1xf32>
    %9 = arith.subf %5, %8 : vector<2x8x1xf32>
    %10 = math.exp %9 : vector<2x8x1xf32>
    %cst_6 = arith.constant dense<0.000000e+00> : vector<2x1xf32>
    %11 = vector.multi_reduction <add>, %10, %cst_6 [1] : vector<2x8x1xf32> to vector<2x1xf32>
    %12 = vector.shape_cast %11 : vector<2x1xf32> to vector<2x1x1xf32>
    %cst_7 = arith.constant 1.000000e+00 : f32
    %13 = vector.broadcast %cst_7 : f32 to vector<2x1x1xf32>
    %14 = arith.divf %13, %12 : vector<2x1x1xf32>
    %15 = vector.broadcast %14 : vector<2x1x1xf32> to vector<2x8x1xf32>
    %16 = arith.mulf %10, %15 : vector<2x8x1xf32>
    %17 = vector.broadcast %16 : vector<2x8x1xf32> to vector<2x8x32xf32>
    %18 = arith.mulf %17, %0 : vector<2x8x32xf32>
    %cst_8 = arith.constant dense<0.000000e+00> : vector<2x32xf32>
    %19 = vector.multi_reduction <add>, %18, %cst_8 [1] : vector<2x8x32xf32> to vector<2x32xf32>
    %c0_9 = arith.constant 0 : index
    %c0_10 = arith.constant 0 : index
    %20 = vector.load %arg3[%c0_9, %c0_10] : memref<2x32xf32, #tpu.memory_space<vmem>>, vector<2x32xf32>
    tpu.vector_store %arg3[%c0_9, %c0_10], %19 {strides = array<i32>} : memref<2x32xf32, #tpu.memory_space<vmem>>, vector<2x32xf32>,
    return
  }
  func.func @transform_0(%arg0: i32) -> (i32, i32, i32) {
    %c0_i32 = arith.constant 0 : i32
    %c0_i32_0 = arith.constant 0 : i32
    %c0_i32_1 = arith.constant 0 : i32
    return %arg0, %c0_i32, %c0_i32_0 : i32, i32, i32
  }
  func.func @transform_1(%arg0: i32) -> (i32, i32, i32) {
    %c0_i32 = arith.constant 0 : i32
    %c0_i32_0 = arith.constant 0 : i32
    %c0_i32_1 = arith.constant 0 : i32
    return %arg0, %c0_i32, %c0_i32_0 : i32, i32, i32
  }
  func.func @transform_2(%arg0: i32) -> (i32, i32) {
    %c0_i32 = arith.constant 0 : i32
    %c0_i32_0 = arith.constant 0 : i32
    return %arg0, %c0_i32 : i32, i32
  }
}

</mosaic_0001>

<bundles_post_ra>
// kernel: tpu_custom_call.1
= control target key start
LH: loop header
LB: loop body
LE: loop exit
PB: predicated region body
PF: predicated region fallthrough
CT: control target
= control target key end

     0   :  { %7 = vsyncpa [#allocation3], 0  ;;  %s240_s0 = inlined_call_operand.hbm [shape: f32[2,8,32], index: 0, kind: input, shape index: {}]   ;;  %s241_s1 = inlined_call_operand.vmem [shape: f32[2,1,32], index: 1, kind: input, shape index: {}]   ;;  %s242_s2 = inlined_call_operand.hbm [shape: f32[2,32], index: 2, kind: output, shape index: {}]  }
   0x1   :  { %8 = vsyncpa [#allocation4], 0  ;;  %s187_s9 = smov [#allocation2]   ;;  %s139_s13 = scalar_lea.hbm %s240_s0, 256 }
   0x2   :  { %s14_s10 = sshll.u32 %s187_s9, 4  ;;  %p140_p0 = scmp.ne.s32.totalorder %s240_s0, %s139_s13  ;;  %s15_s10 = int_to_ptr.vmem [resolvable:$true] %s14_s10 }
   0x3   :  { %p143_p1 = scmp.lt.u32.totalorder %s139_s13, %s240_s0 }
   0x5   :  { %p145_p2 = pnand %p143_p1, %p140_p0 }
   0x7   :  { %148 = shalt.err (!%p145_p2)
}
   0x8   :  { %s149_s18 = scalar_lea.vmem %s15_s10, 256  ;;  %p154_p4 = scmp.lt.s32.totalorder %s15_s10, %s15_s10 }
   0x9   :  { %p150_p3 = scmp.ne.s32.totalorder %s15_s10, %s149_s18  ;;  %p155_p5 = scmp.lt.s32.totalorder %s149_s18, %s149_s18 }
   0xb   :  { %p156_p6 = por %p155_p5, %p154_p4 }
   0xd   :  { %p157_p7 = pnand %p156_p6, %p150_p3 }
   0xf   :  { %160 = shalt.err (!%p157_p7)
}
  0x10   :  { %s188_s19 = smov 128   ;;  %s189_s20 = smov 8  }
  0x11   :  { %20 = dma.hbm_to_vmem [thread:$0]  %s240_s0, 256, %s15_s10, [#allocation3], %s188_s19, %s188_s19, %s189_s20  }
  0x12   :  { %183 = dma.done.wait [#allocation3], 256  }
  0x13   :  { %184 = vsyncadd [#allocation3], 4294967040  ;;  %v26_v0 = vld [vmem:[#allocation2] sm:$0xff]  ;;  %vm44_vm0 = vcmask 261120   ;;  %v27_v2 = vld [vmem:[#allocation2 + $0x8] sm:$0xff]  ;;  %s190_s0 = smov [#allocation5]  }
  0x14   :  { %v125_v1 = vld [vmem:[%s241_s1] ss:$0 sm:$0xff]  ;;  %v126_v4 = vld [vmem:[%s241_s1 + $0x1] ss:$0 sm:$0xff]  ;;  %s116_s1 = sshll.u32 %s190_s0, 4  ;;  %vm105_vm1 = vcmask 1041409   ;;  %s117_s1 = int_to_ptr.vmem [resolvable:$true] %s116_s1 }
  0x15   :  { %v42_v3 = vmul.f32 %v125_v1, %v26_v0  ;;  %v43_v5 = vmul.f32 %v126_v4, %v27_v2  ;;  %vm108_vm2 = vcmask 254976   ;;  %s161_s27 = scalar_lea.vmem %s117_s1, 32  ;;  %p166_p9 = scmp.lt.s32.totalorder %s117_s1, %s117_s1 }
  0x16   :  { %p162_p8 = scmp.ne.s32.totalorder %s117_s1, %s161_s27  ;;  %p167_p10 = scmp.lt.s32.totalorder %s161_s27, %s161_s27 }
  0x17   :  { %v45_v6 = vsel %vm44_vm0, %v42_v3, 0.0  ;;  %v48_v7 = vsel %vm44_vm0, %v43_v5, 0.0 }
  0x18   :  { %46 = vadd.xlane.f32.xlu0 %v45_v6  ;;  %p168_p11 = por %p167_p10, %p166_p9 }
  0x1a   :  { %p169_p12 = pnand %p168_p11, %p162_p8 }
  0x1c   :  { %49 = vadd.xlane.f32.xlu0 %v48_v7 }
  0xa5   :  { %v47_v8 = vpop.xlane.xlu0 %46 }
  0xa6   :  { %v51_v9 = vrot.slane %v47_v8, 4 }
  0xa8   :  { %v52_v10 = vmax.f32 %v47_v8, %v51_v9 }
  0xa9   :  { %v50_v11 = vpop.xlane.xlu0 %49 }
  0xaa   :  { %v53_v12 = vrot.slane %v52_v10, 2  ;;  %v57_v13 = vrot.slane %v50_v11, 4 }
  0xac   :  { %v54_v14 = vmax.f32 %v52_v10, %v53_v12  ;;  %v58_v15 = vmax.f32 %v50_v11, %v57_v13 }
  0xae   :  { %v55_v16 = vrot.slane %v54_v14, 1  ;;  %v59_v17 = vrot.slane %v58_v15, 2 }
  0xb0   :  { %v56_v18 = vmax.f32 %v54_v14, %v55_v16  ;;  %v60_v19 = vmax.f32 %v58_v15, %v59_v17 }
  0xb2   :  { %v63_v20 = vsub.f32 %v47_v8, %v56_v18  ;;  %v61_v21 = vrot.slane %v60_v19, 1 }
  0xb4   :  { %v65_v22 = vmul.f32 1.442695, %v63_v20  ;;  %v62_v23 = vmax.f32 %v60_v19, %v61_v21 }
  0xb6   :  { %131 = vpow2.f32 %v65_v22  ;;  %v64_v24 = vsub.f32 %v50_v11, %v62_v23 }
  0xb8   :  { %v67_v25 = vmul.f32 1.442695, %v64_v24 }
  0xba   :  { %133 = vpow2.f32 %v67_v25 }
  0xc0   :  { %v132_v26 = vpop.eup %131 }
  0xc1   :  { %v69_v27 = vrot.slane %v132_v26, 4 }
  0xc3   :  { %v70_v28 = vadd.f32 %v132_v26, %v69_v27 }
  0xc4   :  { %v134_v29 = vpop.eup %133 }
  0xc5   :  { %v71_v30 = vrot.slane %v70_v28, 2  ;;  %v75_v31 = vrot.slane %v134_v29, 4 }
  0xc7   :  { %v76_v32 = vadd.f32 %v134_v29, %v75_v31  ;;  %v72_v33 = vadd.f32 %v71_v30, %v70_v28 }
  0xc9   :  { %v77_v34 = vrot.slane %v76_v32, 2  ;;  %v73_v35 = vrot.slane %v72_v33, 1 }
  0xcb   :  { %v78_v36 = vadd.f32 %v77_v34, %v76_v32  ;;  %v74_v37 = vadd.f32 %v73_v35, %v72_v33 }
  0xcd   :  { %v79_v38 = vrot.slane %v78_v36, 1  ;;  %135 = vrcp.f32 %v74_v37 }
  0xcf   :  { %v80_v39 = vadd.f32 %v79_v38, %v78_v36 }
  0xd1   :  { %137 = vrcp.f32 %v80_v39 }
  0xd7   :  { %v136_v40 = vpop.eup %135 }
  0xd8   :  { %v85_v41 = vmul.f32 %v136_v40, %v132_v26 }
  0xda   :  { %v87_v42 = vmul.f32 %v85_v41, %v26_v0 }
  0xdb   :  { %v138_v43 = vpop.eup %137 }
  0xdc   :  { %v86_v44 = vmul.f32 %v138_v43, %v134_v29  ;;  %v89_v45 = vsel %vm44_vm0, %v87_v42, 0.0 }
  0xdd   :  { %v90_v46 = vrot.slane %v89_v45, 4 }
  0xde   :  { %v88_v47 = vmul.f32 %v86_v44, %v27_v2 }
  0xdf   :  { %v91_v48 = vadd.f32 %v90_v46, %v89_v45 }
  0xe0   :  { %v96_v49 = vsel %vm44_vm0, %v88_v47, 0.0 }
  0xe1   :  { %v92_v50 = vrot.slane %v91_v48, 2  ;;  %v97_v51 = vrot.slane %v96_v49, 4 }
  0xe3   :  { %v93_v52 = vadd.f32 %v92_v50, %v91_v48  ;;  %v98_v53 = vadd.f32 %v97_v51, %v96_v49 }
  0xe5   :  { %v99_v54 = vrot.slane %v98_v53, 2  ;;  %v94_v55 = vrot.slane %v93_v52, 1 }
  0xe7   :  { %v100_v56 = vadd.f32 %v99_v54, %v98_v53  ;;  %v95_v58 = vadd.f32 %v94_v55, %v93_v52 }
  0xe9   :  { %v101_v57 = vrot.slane %v100_v56, 1 }
  0xeb   :  { %v102_v59 = vadd.f32 %v101_v57, %v100_v56 }
  0xed   :  { %v106_v60 = vsel %vm105_vm1, %v102_v59, %v95_v58 }
  0xee   :  { %109 = vst.msk [vmem:[#allocation5] sm:$0x3] %vm108_vm2, %v106_v60 }
  0xef   :  { %172 = shalt.err (!%p169_p12)
}
  0xf0   :  { %s173_s30 = scalar_lea.hbm %s242_s2, 32 }
  0xf1   :  { %p174_p13 = scmp.ne.s32.totalorder %s242_s2, %s173_s30  ;;  %p177_p0 = scmp.lt.u32.totalorder %s173_s30, %s242_s2 }
  0xf3   :  { %p179_p1 = pnand %p177_p0, %p174_p13 }
  0xf5   :  { %182 = shalt.err (!%p179_p1)
}
  0xf6   :  { %119 = dma.vmem_to_hbm [thread:$0]  %s117_s1, 32, %s242_s2, [#allocation4]  }
  0xf7   :  { %185 = dma.done.wait [#allocation4], 32  }
  0xf8   :  { %186 = vsyncadd [#allocation4], 4294967264 }
  0xf9   :  { %123 = vsyncpa [#allocation3], 1 }
  0xfa   :  { %124 = vsyncpa [#allocation4], 1 }

</bundles_post_ra>
